<compile_context>
chip_gen: v7x
topology: tpu7x:2x2x1
jax: 0.10.0
libtpu: 0.0.40
codegen_flags: <defaults>
</compile_context>

<pallas_src>
import jax
import jax.numpy as jnp
from jax.experimental import pallas as pl
from jax.experimental.pallas import tpu as pltpu


def mlp_kernel(x_ref, wfc_ref, bfc_ref, wproj_ref, bproj_ref, o_ref):
    # x_ref:     (tm, E) f32     wfc_ref:   (E, th) bf16    bfc_ref:   (1, th) f32
    # wproj_ref: (th, E) bf16    bproj_ref: (1, E)  f32     o_ref:     (tm, E) f32
    # o_ref is resident across the h (hidden/reduction) grid axis.
    h_idx = pl.program_id(1)

    # bf16 cast of the activation tile happens in-kernel (VPU work hidden under the MXU)
    # instead of as a separate XLA pass over all of x in HBM.
    xb = x_ref[...].astype(wfc_ref.dtype)

    # c_fc slice: (tm, E) @ (E, th) on the MXU, f32 accumulation, f32 bias.
    h = jnp.dot(xb, wfc_ref[...], preferred_element_type=jnp.float32) + bfc_ref[...]

    # GELU, tanh approximation (matches torch.nn.GELU(approximate='tanh')).
    c = jnp.float32(0.7978845608028654)  # sqrt(2/pi)
    g = 0.5 * h * (1.0 + jnp.tanh(c * (h + 0.044715 * h * h * h)))

    # c_proj slice: (tm, th) @ (th, E) partial product for this hidden slice.
    partial = jnp.dot(g.astype(wproj_ref.dtype), wproj_ref[...],
                      preferred_element_type=jnp.float32)

    # Accumulate straight into the resident output block: init with the folded c_proj
    # bias on the first hidden slice, add partials afterwards.
    @pl.when(h_idx == 0)
    def _():
        o_ref[...] = (partial + bproj_ref[...]).astype(o_ref.dtype)

    @pl.when(h_idx > 0)
    def _():
        o_ref[...] += partial.astype(o_ref.dtype)


def prepare_mlp_params(w_fc, b_fc, w_proj, b_proj, *, compute_dtype=jnp.bfloat16):
    """One-time (init-time) parameter prep, hoisted out of the per-call hot path:
    transpose PyTorch nn.Linear weights to row-major matmul layout and cast to the MXU
    compute dtype. Biases stay f32 (added in the f32 epilogue)."""
    wfc_t = jnp.asarray(w_fc).T.astype(compute_dtype)          # (E, 4E)
    wproj_t = jnp.asarray(w_proj).T.astype(compute_dtype)      # (4E, E)
    bfc2 = jnp.asarray(b_fc, jnp.float32).reshape(1, -1)       # (1, 4E)
    bproj2 = jnp.asarray(b_proj, jnp.float32).reshape(1, -1)   # (1, E)
    return wfc_t, bfc2, wproj_t, bproj2


def _vmem_capacity_bytes():
    try:
        return int(pltpu.get_tpu_info().vmem_capacity_bytes)   # 128 MiB v5e/v6e, 64 MiB v7x
    except Exception:
        return 128 * 1024 * 1024


def _round_up(x, m):
    return -(-x // m) * m


def _largest_hidden_tile(H, target):
    """Largest multiple of 128 <= target that divides H, or None."""
    cand = (min(target, H) // 128) * 128
    while cand >= 128:
        if H % cand == 0:
            return cand
        cand -= 128
    return None


def _vmem_working_set(tm, th, E):
    f32, bf16 = 4, 2
    return (2 * tm * E * f32            # x block, double-buffered
            + 2 * E * th * bf16         # Wfc block, double-buffered
            + 2 * th * E * bf16         # Wproj block, double-buffered
            + 2 * (th + E) * f32        # biases
            + 2 * tm * E * f32          # output block, double-buffered
            + 3 * tm * th * f32)        # (tm, th) intermediate + GELU temps headroom


def mlp_pallas(x, wfc_t, bfc2, wproj_t, bproj2, *, tm=512, th=512):
    """x: (B, T, E). wfc_t/bfc2/wproj_t/bproj2 from prepare_mlp_params."""
    B, T, E = x.shape
    H = wfc_t.shape[1]            # 4E
    M = B * T
    out_dtype = x.dtype

    vmem_cap = _vmem_capacity_bytes()
    budget = int(0.75 * vmem_cap)      # headroom for Mosaic internal scratch

    # ---- row tile -----------------------------------------------------------------
    tm = max(8, _round_up(min(tm, M), 8))
    # Keep >= 2 row tiles for big M so the "parallel" axis can shard across v7x's 2 TCs.
    if M >= 512 and pl.cdiv(M, tm) == 1:
        tm = max(256, _round_up(pl.cdiv(M, 2), 8))

    # ---- hidden tile ---------------------------------------------------------------
    if _vmem_working_set(tm, H, E) <= budget:
        # Full weights fit: make them VMEM-resident (fetched once for the entire grid).
        th = H
    else:
        th = _largest_hidden_tile(H, th) or H
        # Shrink until the double-buffered working set fits the per-generation budget.
        while _vmem_working_set(tm, th, E) > budget:
            if tm > 256:
                tm = max(256, _round_up(tm // 2, 8))
                continue
            smaller = _largest_hidden_tile(H, th - 128) if th > 128 else None
            if smaller is None:
                break
            th = smaller

    # ---- rebalance tm to minimize padded (throwaway) rows ---------------------------
    m_tiles = pl.cdiv(M, tm)
    tm = _round_up(pl.cdiv(M, m_tiles), 8)
    M_pad = m_tiles * tm
    h_tiles = pl.cdiv(H, th)

    x2 = x.reshape(M, E)               # free reshape; f32 cast happens in-kernel
    if M_pad != M:
        x2 = jnp.pad(x2, ((0, M_pad - M), (0, 0)))

    f32b = 4
    w_stream = 1 if h_tiles == 1 else m_tiles   # weights re-streamed per row tile only
    cost = pl.CostEstimate(
        flops=4 * M_pad * E * H,                # two matmuls, 2*M*E*H each
        transcendentals=M_pad * H,              # tanh
        bytes_accessed=(M_pad * E * 2 * f32b
                        + w_stream * (2 * E * H * 2 + (H + E) * f32b)),
    )

    vmem_limit = int(min(max(_vmem_working_set(tm, th, E) + (8 << 20), 32 << 20),
                         int(0.9 * vmem_cap)))

    out = pl.pallas_call(
        mlp_kernel,
        out_shape=jax.ShapeDtypeStruct((M_pad, E), out_dtype),
        grid_spec=pltpu.PrefetchScalarGridSpec(
            num_scalar_prefetch=0,
            grid=(m_tiles, h_tiles),
            in_specs=[
                pl.BlockSpec((tm, E), lambda i, h: (i, 0)),   # x row tile (reused over h)
                pl.BlockSpec((E, th), lambda i, h: (0, h)),   # Wfc^T column block
                pl.BlockSpec((1, th), lambda i, h: (0, h)),   # b_fc slice
                pl.BlockSpec((th, E), lambda i, h: (h, 0)),   # Wproj^T row block
                pl.BlockSpec((1, E), lambda i, h: (0, 0)),    # b_proj (resident)
            ],
            out_specs=pl.BlockSpec((tm, E), lambda i, h: (i, 0)),
        ),
        compiler_params=pltpu.CompilerParams(
            dimension_semantics=("parallel", "arbitrary"),
            vmem_limit_bytes=vmem_limit,
        ),
        cost_estimate=cost,
    )(x2, wfc_t, bfc2, wproj_t, bproj2)

    if M_pad != M:
        out = out[:M]
    return out.reshape(B, T, E)


def mlp_reference(x, w_fc, b_fc, w_proj, b_proj):
    h = jnp.einsum("bte,he->bth", x, w_fc) + b_fc
    c = 0.7978845608028654
    g = 0.5 * h * (1.0 + jnp.tanh(c * (h + 0.044715 * h ** 3)))
    return jnp.einsum("bth,eh->bte", g, w_proj) + b_proj


if __name__ == "__main__":
    # Small, MLP-consistent shapes: batch=2, seq=8, n_embd=32 (hidden = 4*32 = 128).
    B, T, E = 2, 8, 32
    H = 4 * E

    key = jax.random.PRNGKey(0)
    kx, k1, k2, k3, k4 = jax.random.split(key, 5)
    x = jax.random.normal(kx, (B, T, E), dtype=jnp.float32)
    w_fc = 0.02 * jax.random.normal(k1, (H, E), dtype=jnp.float32)
    b_fc = 0.02 * jax.random.normal(k2, (H,), dtype=jnp.float32)
    w_proj = 0.02 * jax.random.normal(k3, (E, H), dtype=jnp.float32)
    b_proj = 0.02 * jax.random.normal(k4, (E,), dtype=jnp.float32)

    # One-time parameter prep (transpose + bf16 cast), hoisted out of the per-call path.
    params = prepare_mlp_params(w_fc, b_fc, w_proj, b_proj)

    y = mlp_pallas(x, *params)
    y = jax.block_until_ready(y)

    # Reference in f32 on the same bf16-rounded x/weights (biases stay f32).
    bf = lambda a: a.astype(jnp.bfloat16).astype(jnp.float32)
    y_ref = mlp_reference(bf(x), bf(w_fc), b_fc, bf(w_proj), b_proj)

    assert y.shape == (B, T, E)
    assert jnp.allclose(y, y_ref, atol=2e-3, rtol=2e-2), float(jnp.max(jnp.abs(y - y_ref)))

    print("KERNEL_OK")
</pallas_src>

<mosaic_0001>
module attributes {stable_mosaic.version = 11 : i64} {
  func.func @mlp_kernel(%arg0: i32, %arg1: i32, %arg2: memref<16x32xf32, #tpu.memory_space<vmem>>, %arg3: memref<32x128xbf16, #tpu.memory_space<vmem>>, %arg4: memref<1x128xf32, #tpu.memory_space<vmem>>, %arg5: memref<128x32xbf16, #tpu.memory_space<vmem>>, %arg6: memref<1x32xf32, #tpu.memory_space<vmem>>, %arg7: memref<16x32xf32, #tpu.memory_space<vmem>>) attributes {dimension_semantics = [#tpu.dimension_semantics<parallel>, #tpu.dimension_semantics<arbitrary>], iteration_bounds = array<i64: 1, 1>, scalar_prefetch = 0 : i64, scratch_operands = 0 : i64, tpu.core_type = #tpu.core_type<tc>, window_params = [{transform_indices = @transform_0, window_bounds = array<i64: 16, 32>}, {transform_indices = @transform_1, window_bounds = array<i64: 32, 128>}, {transform_indices = @transform_2, window_bounds = array<i64: 1, 128>}, {transform_indices = @transform_3, window_bounds = array<i64: 128, 32>}, {pipeline_mode = #tpu.pipeline_mode<synchronous>, transform_indices = @transform_4, window_bounds = array<i64: 1, 32>}, {transform_indices = @transform_5, window_bounds = array<i64: 16, 32>}]} {
    %c0 = arith.constant 0 : index
    %c0_0 = arith.constant 0 : index
    %0 = vector.load %arg2[%c0, %c0_0] : memref<16x32xf32, #tpu.memory_space<vmem>>, vector<16x32xf32>
    %1 = arith.truncf %0 : vector<16x32xf32> to vector<16x32xbf16>
    %c0_1 = arith.constant 0 : index
    %c0_2 = arith.constant 0 : index
    %2 = vector.load %arg3[%c0_1, %c0_2] : memref<32x128xbf16, #tpu.memory_space<vmem>>, vector<32x128xbf16>
    %cst = arith.constant dense<0.000000e+00> : vector<16x128xf32>
    %3 = tpu.matmul %1, %2, %cst {dimension_numbers = #tpu.dot_dimension_numbers<[1], [0], [0], [1], [0, 0, 1, 1], [], []>} : vector<16x32xbf16>, vector<32x128xbf16>, vector<16x128xf32> -> vector<16x128xf32>
    %c0_3 = arith.constant 0 : index
    %c0_4 = arith.constant 0 : index
    %4 = vector.load %arg4[%c0_3, %c0_4] : memref<1x128xf32, #tpu.memory_space<vmem>>, vector<1x128xf32>
    %5 = vector.broadcast %4 : vector<1x128xf32> to vector<16x128xf32>
    %6 = arith.addf %3, %5 : vector<16x128xf32>
    %cst_5 = arith.constant 5.000000e-01 : f32
    %7 = vector.broadcast %cst_5 : f32 to vector<16x128xf32>
    %8 = arith.mulf %7, %6 : vector<16x128xf32>
    %cst_6 = arith.constant 4.471500e-02 : f32
    %9 = vector.broadcast %cst_6 : f32 to vector<16x128xf32>
    %10 = arith.mulf %9, %6 : vector<16x128xf32>
    %11 = arith.mulf %10, %6 : vector<16x128xf32>
    %12 = arith.mulf %11, %6 : vector<16x128xf32>
    %13 = arith.addf %6, %12 : vector<16x128xf32>
    %cst_7 = arith.constant 0.797884583 : f32
    %14 = vector.broadcast %cst_7 : f32 to vector<16x128xf32>
    %15 = arith.mulf %14, %13 : vector<16x128xf32>
    %16 = math.tanh %15 : vector<16x128xf32>
    %cst_8 = arith.constant 1.000000e+00 : f32
    %17 = vector.broadcast %cst_8 : f32 to vector<16x128xf32>
    %18 = arith.addf %17, %16 : vector<16x128xf32>
    %19 = arith.mulf %8, %18 : vector<16x128xf32>
    %20 = arith.truncf %19 : vector<16x128xf32> to vector<16x128xbf16>
    %c0_9 = arith.constant 0 : index
    %c0_10 = arith.constant 0 : index
    %21 = vector.load %arg5[%c0_9, %c0_10] : memref<128x32xbf16, #tpu.memory_space<vmem>>, vector<128x32xbf16>
    %cst_11 = arith.constant dense<0.000000e+00> : vector<16x32xf32>
    %22 = tpu.matmul %20, %21, %cst_11 {dimension_numbers = #tpu.dot_dimension_numbers<[1], [0], [0], [1], [0, 0, 1, 1], [], []>} : vector<16x128xbf16>, vector<128x32xbf16>, vector<16x32xf32> -> vector<16x32xf32>
    %c0_i32 = arith.constant 0 : i32
    %23 = arith.cmpi eq, %arg1, %c0_i32 : i32
    %24 = arith.extui %23 : i1 to i32
    %c0_i32_12 = arith.constant 0 : i32
    %25 = arith.cmpi ne, %24, %c0_i32_12 : i32
    scf.if %25 {
      %c0_15 = arith.constant 0 : index
      %c0_16 = arith.constant 0 : index
      %29 = vector.load %arg6[%c0_15, %c0_16] : memref<1x32xf32, #tpu.memory_space<vmem>>, vector<1x32xf32>
      %30 = vector.broadcast %29 : vector<1x32xf32> to vector<16x32xf32>
      %31 = arith.addf %22, %30 : vector<16x32xf32>
      %c0_17 = arith.constant 0 : index
      %c0_18 = arith.constant 0 : index
      %32 = vector.load %arg7[%c0_17, %c0_18] : memref<16x32xf32, #tpu.memory_space<vmem>>, vector<16x32xf32>
      tpu.vector_store %arg7[%c0_17, %c0_18], %31 {strides = array<i32>} : memref<16x32xf32, #tpu.memory_space<vmem>>, vector<16x32xf32>,
    } else {
    }
    %c0_i32_13 = arith.constant 0 : i32
    %26 = arith.cmpi sgt, %arg1, %c0_i32_13 : i32
    %27 = arith.extui %26 : i1 to i32
    %c0_i32_14 = arith.constant 0 : i32
    %28 = arith.cmpi ne, %27, %c0_i32_14 : i32
    scf.if %28 {
      %c0_15 = arith.constant 0 : index
      %c0_16 = arith.constant 0 : index
      %29 = vector.load %arg7[%c0_15, %c0_16] : memref<16x32xf32, #tpu.memory_space<vmem>>, vector<16x32xf32>
      %30 = arith.addf %29, %22 : vector<16x32xf32>
      %c0_17 = arith.constant 0 : index
      %c0_18 = arith.constant 0 : index
      %31 = vector.load %arg7[%c0_17, %c0_18] : memref<16x32xf32, #tpu.memory_space<vmem>>, vector<16x32xf32>
      tpu.vector_store %arg7[%c0_17, %c0_18], %30 {strides = array<i32>} : memref<16x32xf32, #tpu.memory_space<vmem>>, vector<16x32xf32>,
    } else {
    }
    return
  }
  func.func @transform_0(%arg0: i32, %arg1: i32) -> (i32, i32) {
    %c0_i32 = arith.constant 0 : i32
    %c0_i32_0 = arith.constant 0 : i32
    return %arg0, %c0_i32 : i32, i32
  }
  func.func @transform_1(%arg0: i32, %arg1: i32) -> (i32, i32) {
    %c0_i32 = arith.constant 0 : i32
    %c0_i32_0 = arith.constant 0 : i32
    return %c0_i32, %arg1 : i32, i32
  }
  func.func @transform_2(%arg0: i32, %arg1: i32) -> (i32, i32) {
    %c0_i32 = arith.constant 0 : i32
    %c0_i32_0 = arith.constant 0 : i32
    return %c0_i32, %arg1 : i32, i32
  }
  func.func @transform_3(%arg0: i32, %arg1: i32) -> (i32, i32) {
    %c0_i32 = arith.constant 0 : i32
    %c0_i32_0 = arith.constant 0 : i32
    return %arg1, %c0_i32 : i32, i32
  }
  func.func @transform_4(%arg0: i32, %arg1: i32) -> (i32, i32) {
    %c0_i32 = arith.constant 0 : i32
    %c0_i32_0 = arith.constant 0 : i32
    %c0_i32_1 = arith.constant 0 : i32
    return %c0_i32, %c0_i32_0 : i32, i32
  }
  func.func @transform_5(%arg0: i32, %arg1: i32) -> (i32, i32) {
    %c0_i32 = arith.constant 0 : i32
    %c0_i32_0 = arith.constant 0 : i32
    return %arg0, %c0_i32 : i32, i32
  }
}

</mosaic_0001>

<bundles_post_ra>
// kernel: tpu_custom_call.1
= control target key start
LH: loop header
LB: loop body
LE: loop exit
PB: predicated region body
PF: predicated region fallthrough
CT: control target
= control target key end

     0   :  { %v354_v1 = vmov 0.0   ;;  %vm355_vm0 = vmmov 0   ;;  %vm48_vm1 = vcmask 261120   ;;  %s446_s0 = inlined_call_operand.vmem [shape: f32[16,32], index: 0, kind: input, shape index: {}]   ;;  %s447_s1 = inlined_call_operand.vmem [shape: bf16[32,128], index: 1, kind: input, shape index: {}]   ;;  %s448_s2 = inlined_call_operand.vmem [shape: f32[1,128], index: 2, kind: input, shape index: {}]   ;;  %s449_s3 = inlined_call_operand.vmem [shape: bf16[128,32], index: 3, kind: input, shape index: {}]   ;;  %s450_s4 = inlined_call_operand.vmem [shape: f32[1,32], index: 4, kind: input, shape index: {}]   ;;  %s451_s5 = inlined_call_operand.hbm [shape: f32[16,32], index: 5, kind: output, shape index: {}]  }
   0x1   :  { %v316_v0 = vld [vmem:[%s447_s1] sm:$0xff]   ;;  %283 = vmatprep.subr.bf16.mxu0 %v354_v1  ;;  %291 = vmatprep.subr.bf16.mxu1 %v354_v1  ;;  %v317_v2 = vld [vmem:[%s447_s1 + $0x8] sm:$0xff]  }
   0x2   :  { %284 = vmatpush3.bf16.msra.mxu0 %v316_v0  ;;  %287 = vmatprep.mubr.msk.bf16.mxu0 %vm355_vm0, %v354_v1  ;;  %v22_v3 = vld [vmem:[%s446_s0] sm:$0xff]  ;;  %v23_v4 = vld [vmem:[%s446_s0 + $0x8] sm:$0xff] }
   0x3   :  { %285 = vmatprep.subr.bf16.mxu0 %v354_v1  ;;  %307 = vmatprep.mubr.msk.bf16.mxu1 %vm355_vm0, %v354_v1  ;;  %v24_v5 = vpack.c.bf16 %v23_v4, %v22_v3 }
   0x6   :  { %286 = vmatpush3.bf16.msra.mxu0 %v317_v2 }
   0x7   :  { %10 = vsyncpa [#allocation3], 0  ;;  %v318_v6 = vld [vmem:[%s449_s3] sm:$0xff]   ;;  %v319_v7 = vld [vmem:[%s449_s3 + $0x8] sm:$0xff]   ;;  %s356_s17 = smov [#allocation2]  }
   0x8   :  { %292 = vmatpush3.bf16.msra.mxu1 %v318_v6  ;;  %v320_v8 = vld [vmem:[%s449_s3 + $0x10] sm:$0xff]   ;;  %v321_v9 = vld [vmem:[%s449_s3 + $0x18] sm:$0xff]   ;;  %v322_v10 = vld [vmem:[%s449_s3 + $0x20] sm:$0xff]   ;;  %s247_s18 = sshll.u32 %s356_s17, 4  ;;  %s248_s18 = int_to_ptr.vmem [resolvable:$true] %s247_s18 }
   0x9   :  { %288 = vmatmul.mubr.msk.bf16.vlgmr.msra.gmra.mrb[0].mxu0 %vm48_vm1, %v24_v5  ;;  %293 = vmatprep.subr.bf16.mxu1 %v354_v1  ;;  %v323_v11 = vld [vmem:[%s449_s3 + $0x28] sm:$0xff]   ;;  %v324_v12 = vld [vmem:[%s449_s3 + $0x30] sm:$0xff]   ;;  %v325_v13 = vld [vmem:[%s449_s3 + $0x38] sm:$0xff]   ;;  %s330_s19 = scalar_lea.vmem %s248_s18, 256  ;;  %p335_p1 = scmp.lt.s32.totalorder %s248_s18, %s248_s18 }
   0xa   :  { %v258_v14 = vld [vmem:[%s448_s2] ss:$0 sm:$0xff]  ;;  %p331_p0 = scmp.ne.s32.totalorder %s248_s18, %s330_s19  ;;  %p336_p2 = scmp.lt.s32.totalorder %s330_s19, %s330_s19 }
   0xb   :  { %v270_v40 = vld [vmem:[%s450_s4] ss:$0 sm:$0xff] }
   0xc   :  { %294 = vmatpush3.bf16.msra.mxu1 %v319_v7  ;;  %p337_p3 = por %p336_p2, %p335_p1 }
   0xd   :  { %295 = vmatprep.subr.bf16.mxu1 %v354_v1 }
   0xe   :  { %p338_p4 = pnand %p337_p3, %p331_p0 }
  0x10   :  { %296 = vmatpush3.bf16.msra.mxu1 %v320_v8 }
  0x11   :  { %297 = vmatprep.subr.bf16.mxu1 %v354_v1 }
  0x14   :  { %298 = vmatpush3.bf16.msra.mxu1 %v321_v9 }
  0x15   :  { %299 = vmatprep.subr.bf16.mxu1 %v354_v1 }
  0x18   :  { %300 = vmatpush3.bf16.msra.mxu1 %v322_v10 }
  0x19   :  { %301 = vmatprep.subr.bf16.mxu1 %v354_v1 }
  0x1c   :  { %302 = vmatpush3.bf16.msra.mxu1 %v323_v11 }
  0x1d   :  { %303 = vmatprep.subr.bf16.mxu1 %v354_v1 }
  0x20   :  { %304 = vmatpush3.bf16.msra.mxu1 %v324_v12 }
  0x21   :  { %305 = vmatprep.subr.bf16.mxu1 %v354_v1 }
  0x24   :  { %306 = vmatpush3.bf16.msra.mxu1 %v325_v13 }
  0xdc   :  { %v86_v15 = vpop.f32.mrb[0].mxu0 }
  0xdd   :  { %v87_v16 = vadd.f32 %v258_v14, %v86_v15  ;;  %v289_v17 = vpop.f32.mrb[1].mxu0 }
  0xde   :  { %v89_v18 = vpop.f32.mrb[2].mxu0 }
  0xdf   :  { %v95_v19 = vmul.f32 0.044715, %v87_v16  ;;  %v90_v20 = vadd.f32 %v258_v14, %v89_v18  ;;  %v290_v21 = vpop.f32.mrb[3].mxu0  ;;  %v93_v34 = vmul.f32 0.5, %v87_v16 }
  0xe1   :  { %v97_v22 = vmul.f32 %v95_v19, %v87_v16  ;;  %v96_v23 = vmul.f32 0.044715, %v90_v20  ;;  %v94_v35 = vmul.f32 0.5, %v90_v20 }
  0xe3   :  { %v99_v24 = vmul.f32 %v97_v22, %v87_v16  ;;  %v98_v25 = vmul.f32 %v96_v23, %v90_v20 }
  0xe5   :  { %v100_v26 = vmul.f32 %v98_v25, %v90_v20  ;;  %v101_v27 = vadd.f32 %v99_v24, %v87_v16 }
  0xe7   :  { %v102_v28 = vadd.f32 %v100_v26, %v90_v20  ;;  %v103_v29 = vmul.f32 0.7978846, %v101_v27 }
  0xe9   :  { %v104_v30 = vmul.f32 0.7978846, %v102_v28  ;;  %326 = vtanh.f32 %v103_v29 }
  0xeb   :  { %328 = vtanh.f32 %v104_v30 }
  0xf3   :  { %v327_v31 = vpop.eup %326 }
  0xf4   :  { %v107_v32 = vadd.f32 1.0, %v327_v31 }
  0xf5   :  { %v329_v33 = vpop.eup %328 }
  0xf6   :  { %v108_v36 = vadd.f32 1.0, %v329_v33  ;;  %v109_v37 = vmul.f32 %v107_v32, %v93_v34 }
  0xf8   :  { %v110_v38 = vmul.f32 %v108_v36, %v94_v35 }
  0xfa   :  { %v111_v39 = vpack.c.bf16 %v110_v38, %v109_v37 }
  0xfc   :  { %308 = vmatmul.mubr.bf16.vlgmr.msra.gmra.mrb[0].mxu1 %v111_v39 }
 0x1cf   :  { %v210_v41 = vpop.f32.mrb[0].mxu1 }
 0x1d0   :  { %v228_v42 = vadd.f32 %v270_v40, %v210_v41  ;;  %v309_v43 = vpop.f32.mrb[1].mxu1 }
 0x1d1   :  { %v213_v44 = vpop.f32.mrb[2].mxu1 }
 0x1d2   :  { %230 = vst.msk [vmem:[#allocation2] sm:$0xff] %vm48_vm1, %v228_v42  ;;  %v229_v45 = vadd.f32 %v270_v40, %v213_v44  ;;  %v310_v46 = vpop.f32.mrb[3].mxu1 }
 0x1d4   :  { %231 = vst.msk [vmem:[#allocation2 + $0x8] sm:$0xff] %vm48_vm1, %v229_v45 }
 0x1d5   :  { %341 = shalt.err (!%p338_p4)
}
 0x1d6   :  { %s342_s21 = scalar_lea.hbm %s451_s5, 256 }
 0x1d7   :  { %p343_p5 = scmp.ne.s32.totalorder %s451_s5, %s342_s21  ;;  %p346_p6 = scmp.lt.u32.totalorder %s342_s21, %s451_s5 }
 0x1d9   :  { %p348_p7 = pnand %p346_p6, %p343_p5 }
 0x1db   :  { %351 = shalt.err (!%p348_p7)
}
 0x1dc   :  { %s357_s26 = smov 128   ;;  %s358_s1 = smov 8  }
 0x1dd   :  { %253 = dma.vmem_to_hbm [thread:$0]  %s248_s18, 256, %s451_s5, [#allocation3], %s357_s26, %s357_s26, %s358_s1  }
 0x1de   :  { %352 = dma.done.wait [#allocation3], 256  }
 0x1df   :  { %353 = vsyncadd [#allocation3], 4294967040 }
 0x1e0   :  { %257 = vsyncpa [#allocation3], 1 }

</bundles_post_ra>
